<compile_context>
chip_gen: v6e
topology: v6e:2x2x1
jax: 0.10.0
libtpu: 0.0.40
codegen_flags: <defaults>
</compile_context>

<pallas_src>
import numpy as np
import jax
import jax.numpy as jnp
from jax.experimental import pallas as pl
from jax.experimental.pallas import tpu as pltpu


def encoder_cnn_kernel(x_ref, w_ref, b_ref, out_ref):
    """One grid step = one block of `B` sentences.

    x_ref  : (B*S, E)   bf16  flattened sentence block (row-major per sentence)
    w_ref  : (E, K*C)   bf16  fused conv taps, w_ref[e, k*C + c] = conv_w[c, e, k]
    b_ref  : (1, C)     f32   conv bias
    out_ref: (B, C)     f32   tanh(max_t conv1d(x) + b)
    """
    B, C = out_ref.shape
    E, KC = w_ref.shape
    K = KC // C
    S = x_ref.shape[0] // B
    S_out = S - K + 1                       # == SenLen - 2 for filter_size=3

    # Single fused MXU push over all K taps, f32 accumulation.
    y = jnp.dot(x_ref[...], w_ref[...],
                preferred_element_type=jnp.float32)      # (B*S, K*C)
    y = y.reshape(B, S, KC)

    # Conv1d (valid) = shift-add of the K lane-aligned C-wide tap slices.
    acc = y[:, 0:S_out, 0:C]
    for k in range(1, K):                   # K is static (3)
        acc = acc + y[:, k:k + S_out, k * C:(k + 1) * C]

    pooled = jnp.max(acc, axis=1)           # MaxPool1d(S-2) == global max here
    # bias commutes with the positional max; dropout = identity (eval mode)
    out_ref[...] = jnp.tanh(pooled + b_ref[...])


def encoder_cnn_forward(words, pos1, pos2,
                        word_emb, pos1_emb, pos2_emb,
                        conv_w, conv_b, *, block_rows=128):
    """EncoderCNN.forward for one language.

    words/pos1/pos2: (Len, SenLen) int32
    word_emb: (vocab, dimWE); pos*_emb: (MaxPos, dimWPE)
    conv_w: (dimC, emb_dim, filter_size); conv_b: (dimC,)
    returns: (Len, dimC) f32
    """
    Len, S = words.shape
    C, E, K = conv_w.shape

    # Glue outside the kernel: embedding gathers + feature concat (these ARE
    # the inputs). bf16 operands halve DMA bytes; accumulation stays f32.
    x = jnp.concatenate(
        [word_emb[words], pos1_emb[pos1], pos2_emb[pos2]], axis=-1
    ).astype(jnp.bfloat16)                                   # (Len, S, E)

    # Block size: multiple of 8 (sublane alignment of the (B, C) output and
    # (B*S, E) input blocks). For small Len split into 2 blocks when legal so
    # v7x can shard the "parallel" sentence axis across its two TensorCores;
    # otherwise a single full-extent block (always a legal block shape).
    if Len <= block_rows:
        half = Len // 2
        B = half if (Len >= 16 and half % 8 == 0) else Len
    else:
        B = max(8, (block_rows // 8) * 8)
    pad = (-Len) % B
    if pad:
        x = jnp.pad(x, ((0, pad), (0, 0), (0, 0)))
    n_blocks = (Len + pad) // B

    x2 = x.reshape((Len + pad) * S, E)                       # bf16 (Len*S, E) slab
    # Fused tap weights: w_fused[e, k*C + c] = conv_w[c, e, k]  -> (E, K*C)
    w_fused = jnp.transpose(conv_w, (1, 2, 0)).reshape(E, K * C).astype(jnp.bfloat16)
    b2 = conv_b.reshape(1, C).astype(jnp.float32)

    out = pl.pallas_call(
        encoder_cnn_kernel,
        out_shape=jax.ShapeDtypeStruct((Len + pad, C), jnp.float32),
        grid_spec=pltpu.PrefetchScalarGridSpec(
            num_scalar_prefetch=0,
            grid=(n_blocks,),
            in_specs=[
                pl.BlockSpec((B * S, E), lambda i: (i, 0)),     # sentence block
                pl.BlockSpec((E, K * C), lambda i: (0, 0)),     # grid-invariant
                pl.BlockSpec((1, C), lambda i: (0, 0)),         # grid-invariant
            ],
            out_specs=pl.BlockSpec((B, C), lambda i: (i, 0)),   # lane-dense
        ),
        compiler_params=pltpu.CompilerParams(
            dimension_semantics=("parallel",),   # sentences are independent
            vmem_limit_bytes=48 * 1024 * 1024,   # > v5e 16MiB default, < v7x 64MiB phys
        ),
    )(x2, w_fused, b2)
    return out[:Len]       # drop padded rows (they hold tanh(bias)) — keep this slice


def cnn_encoder_forward(inputs_en, params_en, inputs_zh, params_zh):
    """CNNEncoder.forward: run both language encoders."""
    out_en = encoder_cnn_forward(*inputs_en, *params_en)
    out_zh = encoder_cnn_forward(*inputs_zh, *params_zh)
    return out_en, out_zh


def ref_encoder_cnn(words, pos1, pos2, word_emb, pos1_emb, pos2_emb,
                    conv_w, conv_b):
    """Pure-numpy (f32) replica of EncoderCNN.forward (dropout = identity)."""
    words, pos1, pos2 = map(np.asarray, (words, pos1, pos2))
    word_emb = np.asarray(word_emb, np.float32)
    pos1_emb = np.asarray(pos1_emb, np.float32)
    pos2_emb = np.asarray(pos2_emb, np.float32)
    conv_w = np.asarray(conv_w, np.float32)
    conv_b = np.asarray(conv_b, np.float32)

    embd = np.concatenate(
        [word_emb[words], pos1_emb[pos1], pos2_emb[pos2]], axis=-1)  # (L, S, E)
    x = np.transpose(embd, (0, 2, 1)).astype(np.float32)             # (L, E, S)
    C, E, K = conv_w.shape
    L, _, S = x.shape
    S_out = S - K + 1
    conved = np.empty((L, C, S_out), np.float32)
    for t in range(S_out):
        conved[:, :, t] = np.einsum('lek,cek->lc', x[:, :, t:t + K], conv_w) + conv_b
    pooled = conved.max(axis=2)          # MaxPool1d(S - 2), filter_size = 3
    return np.tanh(pooled)


if __name__ == "__main__":
    key = jax.random.PRNGKey(0)
    ks = jax.random.split(key, 20)

    # Module hyperparameters (stand-ins for the script-level globals).
    dimWE, dimWPE, dimC, filter_size, MaxPos = 32, 8, 128, 3, 32
    E = dimWE + 2 * dimWPE
    vocab_en, vocab_zh = 50, 60
    SenLen_en, SenLen_zh = 16, 24
    Len_en, Len_zh = 16, 8

    # English encoder params + inputs.
    emb_en = 0.1 * jax.random.normal(ks[0], (vocab_en, dimWE), jnp.float32)
    p1e_en = 0.1 * jax.random.normal(ks[1], (MaxPos, dimWPE), jnp.float32)
    p2e_en = 0.1 * jax.random.normal(ks[2], (MaxPos, dimWPE), jnp.float32)
    cw_en = 0.1 * jax.random.normal(ks[3], (dimC, E, filter_size), jnp.float32)
    cb_en = 0.1 * jax.random.normal(ks[4], (dimC,), jnp.float32)
    words_en = jax.random.randint(ks[5], (Len_en, SenLen_en), 0, vocab_en, dtype=jnp.int32)
    pos1_en = jax.random.randint(ks[6], (Len_en, SenLen_en), 0, MaxPos, dtype=jnp.int32)
    pos2_en = jax.random.randint(ks[7], (Len_en, SenLen_en), 0, MaxPos, dtype=jnp.int32)

    # Chinese encoder params + inputs.
    emb_zh = 0.1 * jax.random.normal(ks[8], (vocab_zh, dimWE), jnp.float32)
    p1e_zh = 0.1 * jax.random.normal(ks[9], (MaxPos, dimWPE), jnp.float32)
    p2e_zh = 0.1 * jax.random.normal(ks[10], (MaxPos, dimWPE), jnp.float32)
    cw_zh = 0.1 * jax.random.normal(ks[11], (dimC, E, filter_size), jnp.float32)
    cb_zh = 0.1 * jax.random.normal(ks[12], (dimC,), jnp.float32)
    words_zh = jax.random.randint(ks[13], (Len_zh, SenLen_zh), 0, vocab_zh, dtype=jnp.int32)
    pos1_zh = jax.random.randint(ks[14], (Len_zh, SenLen_zh), 0, MaxPos, dtype=jnp.int32)
    pos2_zh = jax.random.randint(ks[15], (Len_zh, SenLen_zh), 0, MaxPos, dtype=jnp.int32)

    inputs_en = (words_en, pos1_en, pos2_en)
    params_en = (emb_en, p1e_en, p2e_en, cw_en, cb_en)
    inputs_zh = (words_zh, pos1_zh, pos2_zh)
    params_zh = (emb_zh, p1e_zh, p2e_zh, cw_zh, cb_zh)

    out_en, out_zh = cnn_encoder_forward(inputs_en, params_en, inputs_zh, params_zh)
    out_en = jax.block_until_ready(out_en)
    out_zh = jax.block_until_ready(out_zh)

    ref_en = ref_encoder_cnn(*inputs_en, *params_en)
    ref_zh = ref_encoder_cnn(*inputs_zh, *params_zh)
    # bf16 operands (f32 accumulation) vs f32 numpy reference -> looser tol.
    np.testing.assert_allclose(np.asarray(out_en), ref_en, rtol=2e-2, atol=2e-2)
    np.testing.assert_allclose(np.asarray(out_zh), ref_zh, rtol=2e-2, atol=2e-2)

    print("KERNEL_OK")
</pallas_src>

<mosaic_0001>
module attributes {stable_mosaic.version = 11 : i64} {
  func.func @encoder_cnn_kernel(%arg0: i32, %arg1: memref<128x48xbf16, #tpu.memory_space<vmem>>, %arg2: memref<48x384xbf16, #tpu.memory_space<vmem>>, %arg3: memref<1x128xf32, #tpu.memory_space<vmem>>, %arg4: memref<8x128xf32, #tpu.memory_space<vmem>>) attributes {dimension_semantics = [#tpu.dimension_semantics<parallel>], iteration_bounds = array<i64: 2>, scalar_prefetch = 0 : i64, scratch_operands = 0 : i64, tpu.core_type = #tpu.core_type<tc>, window_params = [{transform_indices = @transform_0, window_bounds = array<i64: 128, 48>}, {pipeline_mode = #tpu.pipeline_mode<synchronous>, transform_indices = @transform_1, window_bounds = array<i64: 48, 384>}, {pipeline_mode = #tpu.pipeline_mode<synchronous>, transform_indices = @transform_2, window_bounds = array<i64: 1, 128>}, {transform_indices = @transform_3, window_bounds = array<i64: 8, 128>}]} {
    %c0 = arith.constant 0 : index
    %c0_0 = arith.constant 0 : index
    %0 = vector.load %arg1[%c0, %c0_0] : memref<128x48xbf16, #tpu.memory_space<vmem>>, vector<128x48xbf16>
    %c0_1 = arith.constant 0 : index
    %c0_2 = arith.constant 0 : index
    %1 = vector.load %arg2[%c0_1, %c0_2] : memref<48x384xbf16, #tpu.memory_space<vmem>>, vector<48x384xbf16>
    %cst = arith.constant dense<0.000000e+00> : vector<128x384xf32>
    %2 = tpu.matmul %0, %1, %cst {dimension_numbers = #tpu.dot_dimension_numbers<[1], [0], [0], [1], [0, 0, 1, 1], [], []>} : vector<128x48xbf16>, vector<48x384xbf16>, vector<128x384xf32> -> vector<128x384xf32>
    %3 = vector.shape_cast %2 : vector<128x384xf32> to vector<8x16x384xf32>
    %4 = vector.extract_strided_slice %3 {offsets = [0, 0, 0], sizes = [8, 14, 128], strides = [1, 1, 1]} : vector<8x16x384xf32> to vector<8x14x128xf32>
    %5 = vector.extract_strided_slice %3 {offsets = [0, 1, 128], sizes = [8, 14, 128], strides = [1, 1, 1]} : vector<8x16x384xf32> to vector<8x14x128xf32>
    %6 = arith.addf %4, %5 : vector<8x14x128xf32>
    %7 = vector.extract_strided_slice %3 {offsets = [0, 2, 256], sizes = [8, 14, 128], strides = [1, 1, 1]} : vector<8x16x384xf32> to vector<8x14x128xf32>
    %8 = arith.addf %6, %7 : vector<8x14x128xf32>
    %cst_3 = arith.constant dense<0xFF800000> : vector<8x128xf32>
    %9 = vector.multi_reduction <maximumf>, %8, %cst_3 [1] : vector<8x14x128xf32> to vector<8x128xf32>
    %c0_4 = arith.constant 0 : index
    %c0_5 = arith.constant 0 : index
    %10 = vector.load %arg3[%c0_4, %c0_5] : memref<1x128xf32, #tpu.memory_space<vmem>>, vector<1x128xf32>
    %11 = vector.broadcast %10 : vector<1x128xf32> to vector<8x128xf32>
    %12 = arith.addf %9, %11 : vector<8x128xf32>
    %13 = math.tanh %12 : vector<8x128xf32>
    %c0_6 = arith.constant 0 : index
    %c0_7 = arith.constant 0 : index
    %14 = vector.load %arg4[%c0_6, %c0_7] : memref<8x128xf32, #tpu.memory_space<vmem>>, vector<8x128xf32>
    tpu.vector_store %arg4[%c0_6, %c0_7], %13 {strides = array<i32>} : memref<8x128xf32, #tpu.memory_space<vmem>>, vector<8x128xf32>,
    return
  }
  func.func @transform_0(%arg0: i32) -> (i32, i32) {
    %c0_i32 = arith.constant 0 : i32
    %c0_i32_0 = arith.constant 0 : i32
    return %arg0, %c0_i32 : i32, i32
  }
  func.func @transform_1(%arg0: i32) -> (i32, i32) {
    %c0_i32 = arith.constant 0 : i32
    %c0_i32_0 = arith.constant 0 : i32
    %c0_i32_1 = arith.constant 0 : i32
    return %c0_i32, %c0_i32_0 : i32, i32
  }
  func.func @transform_2(%arg0: i32) -> (i32, i32) {
    %c0_i32 = arith.constant 0 : i32
    %c0_i32_0 = arith.constant 0 : i32
    %c0_i32_1 = arith.constant 0 : i32
    return %c0_i32, %c0_i32_0 : i32, i32
  }
  func.func @transform_3(%arg0: i32) -> (i32, i32) {
    %c0_i32 = arith.constant 0 : i32
    %c0_i32_0 = arith.constant 0 : i32
    return %arg0, %c0_i32 : i32, i32
  }
}

</mosaic_0001>

<bundles_post_ra>
// kernel: tpu_custom_call.1
= control target key start
LH: loop header
LB: loop body
LE: loop exit
PB: predicated region body
PF: predicated region fallthrough
CT: control target
= control target key end

     0   :  { %8 = vsyncpa [#allocation3], 0  ;;  %s1316_s0 = inlined_call_operand.vmem [shape: bf16[256,48], index: 0, kind: input, shape index: {}]   ;;  %s1317_s1 = inlined_call_operand.vmem [shape: bf16[48,384], index: 1, kind: input, shape index: {}]   ;;  %s1318_s2 = inlined_call_operand.vmem [shape: f32[1,128], index: 2, kind: input, shape index: {}]   ;;  %s1319_s3 = inlined_call_operand.hbm [shape: f32[16,128], index: 3, kind: output, shape index: {}]  }
   0x1   :  { %10 = vsyncpa [#allocation3 + $0x1], 0  ;;  %s1104_s12 = smov 0   ;;  %s1106_s13 = smov 0  }
   0x2   :  { %s1108_s14 = smov 0   ;;  %s1110_s15 = smov 0  }
   0x3 LB: > { %s1125_s16 = sadd.s32 4294967295, %s1080_s15   ;;  %s860_s17 = sadd.s32 4294967294, %s1080_s15   ;;  %s1080_s15 = sphi %s1110_s15, %s1325_s15   ;;  %s1076_s14 = sphi %s1108_s14, %s1324_s14   ;;  %s1072_s13 = sphi %s1106_s13, %s1323_s13   ;;  %s1068_s12 = sphi %s1104_s12, %s1322_s12  }
   0x4   : > { %s1129_s18 = sadd.s32 1, %s1080_s15   ;;  %s91_s19 = sadd.s32 1, %s1076_s14 }
   0x5   : > { %s88_s20 = ssub.s32 %s1080_s15, %s1129_s18  ;;  %p101_p0 = scmp.ne.s32.totalorder %s1076_s14, %s1072_s13 }
   0x6   : > { %p89_p1 = scmp.eq.s32.totalorder %s88_s20, 0  ;;  %p102_p2 = scmp.eq.s32.totalorder %s1125_s16, 1 }
   0x7   : > { %p107_p3 = scmp.ne.s32.totalorder %s1072_s13, %s1068_s12  ;;  %p108_p4 = scmp.eq.s32.totalorder %s860_s17, 1 }
   0x8   : > { %s1140_s21 = scalar_select %p89_p1, %s1076_s14, %s91_s19  }
   0x9   : > { %p1142_p5 = por %p102_p2, %p101_p0  ;;  %p1146_p6 = por %p108_p4, %p107_p3 }
   0xa   : > { %p863_p7 = scmp.ge.s32.totalorder %s1080_s15, 1  ;;  %p141_p8 = scmp.lt.s32.totalorder %s1080_s15, 3 }
   0xc   : > { %p142_p9 = pnand %p863_p7, %p141_p8 }
   0xd   : > { %s865_s26 = sshll.u32 (!%p142_p9), %s1125_s16, 4  ;;  %s162_s4 = sand.u32 (!%p142_p9), 1, %s1072_s13  }
   0xe   : > { %145 = sbr.rel (%p142_p9) target bundleno = 327 (0x147), region = 32  ;;  %p166_p10 = scmp.lt.s32.totalorder (!%p142_p9), %s865_s26, 31 }
   0xf   : > { %s864_s5 = sshll.u32 (!%p142_p9), %s162_s4, 3  ;;  %s902_s6 = sshll.u32 (!%p142_p9), %s1125_s16, 7 }
  0x10   : > { %s164_s7 = scalar_lea.vmem (!%p142_p9), [#allocation2], %s864_s5  ;;  %s788_s17 = scalar_lea.sflag (!%p142_p9), [#allocation3], %s162_s4 }
  0x11   : > { %s1083_s19 = smov (!%p142_p9), [#allocation2]  }
  0x12   : > { %s1024_s20 = sshll.u32 (!%p142_p9), %s1083_s19, 4  ;;  %s1025_s20 = int_to_ptr.vmem [resolvable:$false] %s1024_s20 }
  0x13   : > { %v984_v0 = vld [vmem:[%s1317_s1 + $0x34] ss:$12 sps:$4 sm:$0xff]   ;;  %v986_v1 = vld [vmem:[%s1317_s1 + $0x30] ss:$12 sps:$4 sm:$0xff]   ;;  %v1082_v2 = vmov 0   ;;  %s1327_s26 = smov (!%p166_p10, %s865_s26), 31 }
  0x14   : > { %345 = vmatprep.mubr.bf16.mxu0 %v1082_v2  ;;  %405 = vmatprep.mubr.bf16.mxu1 %v1082_v2  ;;  %v987_v3 = vld [vmem:[%s1317_s1 + $0x1c] ss:$12 sps:$4 sm:$0xff]   ;;  %v989_v4 = vld [vmem:[%s1317_s1 + $0x18] ss:$12 sps:$4 sm:$0xff]   ;;  %s866_s8 = sshll.u32 %s1327_s26, 2  ;;  %vm288_vm0 = vcmask 392192  }
  0x15   : > { %323 = vmatprep.subr.bf16.mxu0 %v984_v0  ;;  %938 = vmatprep.subr.bf16.mxu1 %v984_v0  ;;  %v990_v5 = vld [vmem:[%s1317_s1 + $0x4] ss:$12 sps:$4 sm:$0xff]   ;;  %s1171_s11 = scalar_lea.vmem %s1316_s0, %s866_s8  ;;  %v992_v6 = vld [vmem:[%s1317_s1] ss:$12 sps:$4 sm:$0xff]   ;;  %v999_v11 = vld [vmem:[%s1317_s1 + $0x8] ss:$12 sps:$4 sm:$0xff]  }
  0x16   : > { %324 = vmatpush1.bf16.msra.mxu0 %v986_v1  ;;  %941 = vmatpush1.bf16.msra.mxu1 %v986_v1  ;;  %v995_v7 = vld [vmem:[%s1317_s1 + $0x38] ss:$12 sps:$4 sm:$0xff]   ;;  %v994_v9 = vld [vmem:[%s1171_s11 + $0x30] sm:$0xff]   ;;  %v998_v10 = vld [vmem:[%s1317_s1 + $0x20] ss:$12 sps:$4 sm:$0xff]   ;;  %vm539_vm1 = vcmask 1046528  }
  0x17   : > { %325 = vmatprep.subr.bf16.mxu0 %v987_v3  ;;  %939 = vmatprep.subr.bf16.mxu1 %v987_v3  ;;  %v993_v8 = vld [vmem:[%s1171_s11] sm:$0xff]   ;;  %v996_v12 = vld [vmem:[%s1171_s11 + $0x8] sm:$0xff]   ;;  %v997_v13 = vld [vmem:[%s1171_s11 + $0x38] sm:$0xff]   ;;  %vm612_vm2 = vcmask 1045504   ;;  %vm765_vm3 = vcmask 1041409   ;;  %vm768_vm4 = vcmask 1042434  }
  0x18   : > { %v1000_v14 = vld [vmem:[%s1171_s11 + $0x10] sm:$0xff]   ;;  %v1001_v15 = vld [vmem:[%s1171_s11 + $0x18] sm:$0xff]   ;;  %v1002_v16 = vld [vmem:[%s1171_s11 + $0x20] sm:$0xff]   ;;  %vm771_vm5 = vcmask 1043459   ;;  %vm774_vm6 = vcmask 1044484   ;;  %vm777_vm7 = vcmask 1045509  }
  0x19   : > { %v1003_v17 = vld [vmem:[%s1171_s11 + $0x28] sm:$0xff]   ;;  %vm780_vm8 = vcmask 1046534   ;;  %s801_s8 = sshll.u32 %s164_s7, 4  ;;  %vm783_vm9 = vcmask 1047559   ;;  %s1279_s11 = scalar_lea.hbm %s1319_s3, %s902_s6  ;;  %s802_s8 = int_to_ptr.vmem [resolvable:$true] %s801_s8 }
  0x1a   : > { %326 = vmatpush1.bf16.msra.mxu0 %v989_v4  ;;  %942 = vmatpush1.bf16.msra.mxu1 %v989_v4  ;;  %s1020_s16 = scalar_lea.vmem %s802_s8, 128  ;;  %s1026_s24 = scalar_lea.vmem %s1025_s20, 256 }
  0x1b   : > { %327 = vmatprep.subr.bf16.mxu0 %v990_v5  ;;  %940 = vmatprep.subr.bf16.mxu1 %v990_v5  ;;  %p1021_p11 = scmp.ne.s32.totalorder %s802_s8, %s1020_s16  ;;  %p1027_p0 = scmp.lt.s32.totalorder %s802_s8, %s1025_s20 }
  0x1c   : > { %p1028_p1 = scmp.lt.s32.totalorder %s1026_s24, %s1020_s16 }
  0x1d   : > { %p1022_p12 = pnand %p1021_p11, %p1142_p5 }
  0x1e   : > { %328 = vmatpush1.bf16.msra.mxu0 %v992_v6  ;;  %943 = vmatpush1.bf16.msra.mxu1 %v992_v6  ;;  %p1029_p2 = por %p1028_p1, %p1027_p0 }
  0x1f   : > { %916 = vmatprep.subr.bf16.mxu1 %v995_v7  ;;  %p1023_p13 = pneg %p1022_p12 }
  0x21   : > { %884 = vmatmul.mubr.msk.bf16.vlgmr.msra.gmra.mxu0 %vm288_vm0, %v993_v8  ;;  %890 = vmatmul.mubr.msk.bf16.vlgmr.msra.gmra.mxu1 %vm288_vm0, %v994_v9  ;;  %p1030_p3 = pnand %p1029_p2, %p1023_p13 }
  0x22   : > { %917 = vmatpush3.bf16.msra.mxu1 %v995_v7  ;;  %355 = vmatprep.mubr.bf16.mxu0 %v1082_v2 }
  0x23   : > { %415 = vmatprep.mubr.bf16.mxu1 %v1082_v2  ;;  %918 = vmatprep.subr.bf16.mxu1 %v998_v10 }
  0x26   : > { %919 = vmatpush3.bf16.msra.mxu1 %v998_v10 }
  0x27   : > { %920 = vmatprep.subr.bf16.mxu1 %v999_v11 }
  0x29   : > { %885 = vmatmul.mubr.msk.bf16.gmra.mxu0 %vm288_vm0, %v996_v12  ;;  %891 = vmatmul.mubr.msk.bf16.gmra.mxu1 %vm288_vm0, %v997_v13 }
  0x2a   : > { %921 = vmatpush3.bf16.msra.mxu1 %v999_v11  ;;  %365 = vmatprep.mubr.bf16.mxu0 %v1082_v2 }
  0x2b   : > { %922 = vmatprep.mubr.msk.bf16.mxu1 %vm288_vm0, %v993_v8 }
  0x31   : > { %886 = vmatmul.mubr.msk.bf16.gmra.mxu0 %vm288_vm0, %v1000_v14  ;;  %923 = vmatmul.mubr.msk.bf16.vlgmr.msra.gmra.mxu1 %vm288_vm0, %v996_v12 }
  0x32   : > { %375 = vmatprep.mubr.bf16.mxu0 %v1082_v2  ;;  %926 = vmatprep.mubr.msk.bf16.mxu1 %vm288_vm0, %v1000_v14 }
  0x39   : > { %887 = vmatmul.mubr.msk.bf16.gmra.mxu0 %vm288_vm0, %v1001_v15  ;;  %927 = vmatmul.mubr.msk.bf16.gmra.mxu1 %vm288_vm0, %v1001_v15 }
  0x3a   : > { %385 = vmatprep.mubr.bf16.mxu0 %v1082_v2  ;;  %930 = vmatprep.mubr.msk.bf16.mxu1 %vm288_vm0, %v1002_v16 }
  0x41   : > { %888 = vmatmul.mubr.msk.bf16.gmra.mxu0 %vm288_vm0, %v1002_v16  ;;  %931 = vmatmul.mubr.msk.bf16.gmra.mxu1 %vm288_vm0, %v1003_v17 }
  0x42   : > { %395 = vmatprep.mubr.bf16.mxu0 %v1082_v2  ;;  %934 = vmatprep.mubr.msk.bf16.mxu1 %vm288_vm0, %v994_v9 }
  0x49   : > { %889 = vmatmul.mubr.msk.bf16.gmra.mxu0 %vm288_vm0, %v1003_v17  ;;  %935 = vmatmul.mubr.msk.bf16.gmra.mxu1 %vm288_vm0, %v997_v13 }
  0xe1   : > { %v347_v18 = vpop.f32.mrf.mxu0  ;;  %v1209_v19 = vpop.f32.mrf.mxu1 }
  0xe3   : > { %v349_v20 = vpop.f32.mrf.mxu0  ;;  %v1211_v21 = vpop.f32.mrf.mxu1 }
  0xe4   : > { %v540_v41 = vrot.slane %v349_v20, 1 }
  0xe5   : > { %v351_v22 = vpop.f32.mrf.mxu0  ;;  %v1213_v23 = vpop.f32.mrf.mxu1 }
  0xe7   : > { %v353_v24 = vpop.f32.mrf.mxu0  ;;  %v1215_v25 = vpop.f32.mrf.mxu1 }
  0xe8   : > { %v541_v37 = vrot.slane %v353_v24, 1  ;;  %v559_v12 = vrot.slane %v1215_v25, 1 }
  0xe9   : > { %v357_v26 = vpop.f32.mrf.mxu0  ;;  %v1217_v27 = vpop.f32.mrf.mxu1 }
  0xea   : > { %v542_v46 = vsel %vm539_vm1, %v540_v41, %v541_v37  ;;  %v581_v57 = vadd.f32 %v541_v37, %v351_v22 }
  0xeb   : > { %v359_v28 = vpop.f32.mrf.mxu0  ;;  %v1219_v29 = vpop.f32.mrf.mxu1  ;;  %v580_v56 = vadd.f32 %v542_v46, %v347_v18 }
  0xec   : > { %v543_v38 = vrot.slane %v359_v28, 1 }
  0xed   : > { %v361_v30 = vpop.f32.mrf.mxu0  ;;  %v1221_v31 = vpop.f32.mrf.mxu1 }
  0xef   : > { %v363_v32 = vpop.f32.mrf.mxu0  ;;  %v1223_v33 = vpop.f32.mrf.mxu1 }
  0xf0   : > { %v544_v34 = vrot.slane %v363_v32, 1 }
  0xf1   : > { %v367_v35 = vpop.f32.mrf.mxu0  ;;  %v924_v36 = vpop.f32.mrf.mxu1 }
  0xf2   : > { %v545_v42 = vsel %vm539_vm1, %v543_v38, %v544_v34  ;;  %v616_v43 = vrot.slane %v924_v36, 2  ;;  %v583_v47 = vadd.f32 %v544_v34, %v361_v30  ;;  %v558_v36 = vrot.slane %v1211_v21, 1 }
  0xf3   : > { %v369_v39 = vpop.f32.mrf.mxu0  ;;  %v460_v40 = vpop.f32.mrf.mxu1  ;;  %v582_v49 = vadd.f32 %v545_v42, %v357_v26 }
  0xf4   : > { %v613_v52 = vrot.slane %v460_v40, 2  ;;  %v546_v5 = vrot.slane %v369_v39, 1 }
  0xf5   : > { %v371_v44 = vpop.f32.mrf.mxu0  ;;  %v925_v45 = vpop.f32.mrf.mxu1 }
  0xf6   : > { %v617_v48 = vrot.slane %v925_v45, 2 }
  0xf7   : > { %v373_v50 = vpop.f32.mrf.mxu0  ;;  %v463_v51 = vpop.f32.mrf.mxu1 }
  0xf8   : > { %v618_v53 = vsel %vm612_vm2, %v616_v43, %v617_v48  ;;  %v656_v54 = vadd.f32 %v617_v48, %v583_v47  ;;  %v614_v55 = vrot.slane %v463_v51, 2  ;;  %v547_v62 = vrot.slane %v373_v50, 1 }
  0xf9   : > { %v655_v58 = vadd.f32 %v618_v53, %v582_v49  ;;  %v377_v59 = vpop.f32.mrf.mxu0  ;;  %v928_v60 = vpop.f32.mrf.mxu1  ;;  %v562_v47 = vrot.slane %v1223_v33, 1 }
  0xfa   : > { %v677_v61 = vsel %vm612_vm2, %v656_v54, -inf  ;;  %v615_v63 = vsel %vm612_vm2, %v613_v52, %v614_v55  ;;  %v654_v2 = vadd.f32 %v614_v55, %v581_v57  ;;  %v548_v10 = vsel %vm539_vm1, %v546_v5, %v547_v62 }
  0xfb   : > { %v678_v0 = vmax.f32 %v655_v58, %v677_v61  ;;  %v653_v1 = vadd.f32 %v615_v63, %v580_v56  ;;  %v379_v3 = vpop.f32.mrf.mxu0  ;;  %v476_v4 = vpop.f32.mrf.mxu1  ;;  %v622_v14 = vrot.slane %v928_v60, 2  ;;  %v584_v26 = vadd.f32 %v548_v10, %v367_v35 }
  0xfc   : > { %v669_v7 = vsel %vm612_vm2, %v654_v2, -inf  ;;  %v549_v15 = vrot.slane %v379_v3, 1  ;;  %v619_v18 = vrot.slane %v476_v4, 2  ;;  %v585_v28 = vadd.f32 %v547_v62, %v371_v44 }
  0xfd   : > { %v679_v6 = vrot.slane %v678_v0, 4  ;;  %v381_v8 = vpop.f32.mrf.mxu0  ;;  %v929_v9 = vpop.f32.mrf.mxu1  ;;  %v670_v11 = vmax.f32 %v653_v1, %v669_v7  ;;  %v560_v35 = vsel %vm539_vm1, %v558_v36, %v559_v12  ;;  %v1246_v54 = vadd.f32 %v559_v12, %v1213_v23 }
  0xfe   : > { %v623_v20 = vrot.slane %v929_v9, 2  ;;  %v561_v55 = vrot.slane %v1219_v29, 1  ;;  %v1250_v33 = vadd.f32 %v560_v35, %v1209_v19  ;;  %v595_v7 = vadd.f32 %v562_v47, %v1221_v31 }
  0xff   : > { %v680_v13 = vmax.f32 %v678_v0, %v679_v6  ;;  %v383_v16 = vpop.f32.mrf.mxu0  ;;  %v479_v17 = vpop.f32.mrf.mxu1  ;;  %v671_v30 = vrot.slane %v670_v11, 4 }
 0x100   : > { %v550_v22 = vrot.slane %v383_v16, 1  ;;  %v620_v24 = vrot.slane %v479_v17, 2  ;;  %v624_v44 = vsel %vm612_vm2, %v622_v14, %v623_v20  ;;  %v563_v63 = vsel %vm539_vm1, %v561_v55, %v562_v47 }
 0x101   : > { %v387_v32 = vpop.f32.mrf.mxu0  ;;  %v1233_v34 = vpop.f32.mrf.mxu1  ;;  %v681_v39 = vrot.slane %v680_v13, 2  ;;  %v672_v48 = vmax.f32 %v670_v11, %v671_v30  ;;  %v594_v16 = vadd.f32 %v563_v63, %v1217_v27 }
 0x102   : > { %v551_v37 = vsel %vm539_vm1, %v549_v15, %v550_v22  ;;  %v587_v25 = vadd.f32 %v550_v22, %v381_v8  ;;  %v621_v38 = vsel %vm612_vm2, %v619_v18, %v620_v24  ;;  %v658_v42 = vadd.f32 %v620_v24, %v585_v28 }
 0x103   : > { %v586_v40 = vadd.f32 %v551_v37, %v377_v59  ;;  %v657_v41 = vadd.f32 %v621_v38, %v584_v26  ;;  %v389_v43 = vpop.f32.mrf.mxu0  ;;  %v492_v45 = vpop.f32.mrf.mxu1  ;;  %v682_v56 = vmax.f32 %v680_v13, %v681_v39  ;;  %v673_v0 = vrot.slane %v672_v48, 2 }
 0x104   : > { %v660_v46 = vadd.f32 %v623_v20, %v587_v25  ;;  %v685_v49 = vsel %vm612_vm2, %v658_v42, -inf  ;;  %v552_v61 = vrot.slane %v389_v43, 1  ;;  %v625_v5 = vrot.slane %v492_v45, 2 }
 0x105   : > { %v659_v21 = vadd.f32 %v624_v44, %v586_v40  ;;  %v391_v50 = vpop.f32.mrf.mxu0  ;;  %v1242_v51 = vpop.f32.mrf.mxu1  ;;  %v686_v53 = vmax.f32 %v657_v41, %v685_v49  ;;  %v683_v8 = vrot.slane %v682_v56, 1  ;;  %v628_v18 = vrot.slane %v1233_v34, 2 }
 0x106   : > { %v693_v52 = vsel %vm612_vm2, %v660_v46, -inf  ;;  %v674_v26 = vmax.f32 %v672_v48, %v673_v0  ;;  %v629_v36 = vrot.slane %v1242_v51, 2 }
 0x107   : > { %v694_v57 = vmax.f32 %v659_v21, %v693_v52  ;;  %v393_v58 = vpop.f32.mrf.mxu0  ;;  %v495_v59 = vpop.f32.mrf.mxu1  ;;  %v687_v60 = vrot.slane %v686_v53, 4 }
 0x108   : > { %v553_v62 = vrot.slane %v393_v58, 1  ;;  %v626_v2 = vrot.slane %v495_v59, 2  ;;  %v675_v21 = vrot.slane %v674_v26, 1  ;;  %v630_v52 = vsel %vm612_vm2, %v628_v18, %v629_v36 }
 0x109   : > { %v695_v1 = vrot.slane %v694_v57, 4  ;;  %v397_v3 = vpop.f32.mrf.mxu0  ;;  %v936_v23 = vpop.f32.mrf.mxu1  ;;  %v688_v4 = vmax.f32 %v686_v53, %v687_v60 }
 0x10a   : > { %v554_v29 = vsel %vm539_vm1, %v552_v61, %v553_v62  ;;  %v589_v6 = vadd.f32 %v553_v62, %v391_v50  ;;  %v627_v13 = vsel %vm612_vm2, %v625_v5, %v626_v2  ;;  %v634_v15 = vrot.slane %v936_v23, 2 }
 0x10b   : > { %v696_v19 = vmax.f32 %v694_v57, %v695_v1  ;;  %v588_v9 = vadd.f32 %v554_v29, %v387_v32  ;;  %v399_v10 = vpop.f32.mrf.mxu0  ;;  %v508_v11 = vpop.f32.mrf.mxu1  ;;  %v689_v12 = vrot.slane %v688_v4, 2  ;;  %v684_v32 = vmax.f32 %v682_v56, %v683_v8  ;;  %v900_v57 = vld [vmem:[%s1318_s2] ss:$0 sm:$0xff] }
 0x10c   : > { %v662_v14 = vadd.f32 %v626_v2, %v589_v6  ;;  %v555_v25 = vrot.slane %v399_v10, 1  ;;  %v631_v40 = vrot.slane %v508_v11, 2 }
 0x10d   : > { %v697_v17 = vrot.slane %v696_v19, 2  ;;  %v661_v20 = vadd.f32 %v627_v13, %v588_v9  ;;  %v401_v22 = vpop.f32.mrf.mxu0  ;;  %v937_v24 = vpop.f32.mrf.mxu1  ;;  %v690_v31 = vmax.f32 %v688_v4, %v689_v12  ;;  %v741_v4 = vadd.f32 %v900_v57, %v684_v32 }
 0x10e   : > { %v701_v28 = vsel %vm612_vm2, %v662_v14, -inf  ;;  %v635_v30 = vrot.slane %v937_v24, 2 }
 0x10f   : > { %v702_v37 = vmax.f32 %v661_v20, %v701_v28  ;;  %v403_v38 = vpop.f32.mrf.mxu0  ;;  %v511_v39 = vpop.f32.mrf.mxu1  ;;  %v698_v42 = vmax.f32 %v696_v19, %v697_v17  ;;  %v691_v44 = vrot.slane %v690_v31, 1  ;;  %1004 = vtanh.f32 %v741_v4 }
 0x110   : > { %v636_v27 = vsel %vm612_vm2, %v634_v15, %v635_v30  ;;  %v668_v41 = vadd.f32 %v635_v30, %v595_v7  ;;  %v556_v34 = vrot.slane %v403_v38, 1  ;;  %v632_v35 = vrot.slane %v511_v39, 2 }
 0x111   : > { %v703_v43 = vrot.slane %v702_v37, 4  ;;  %v667_v45 = vadd.f32 %v636_v27, %v594_v16  ;;  %v699_v58 = vrot.slane %v698_v42, 1  ;;  %v692_v62 = vmax.f32 %v690_v31, %v691_v44 }
 0x112   : > { %v725_v46 = vsel %vm612_vm2, %v668_v41, -inf  ;;  %v557_v47 = vsel %vm539_vm1, %v555_v25, %v556_v34  ;;  %v591_v48 = vadd.f32 %v556_v34, %v401_v22  ;;  %v633_v55 = vsel %vm612_vm2, %v631_v40, %v632_v35 }
 0x113   : > { %v704_v49 = vmax.f32 %v702_v37, %v703_v43  ;;  %v726_v50 = vmax.f32 %v667_v45, %v725_v46  ;;  %v590_v51 = vadd.f32 %v557_v47, %v397_v3  ;;  %v666_v56 = vadd.f32 %v632_v35, %v1246_v54 }
 0x114   : > { %v664_v53 = vadd.f32 %v629_v36, %v591_v48  ;;  %v665_v0 = vadd.f32 %v633_v55, %v1250_v33  ;;  %v676_v54 = vmax.f32 %v674_v26, %v675_v21  ;;  %v700_v29 = vmax.f32 %v698_v42, %v699_v58 }
 0x115   : > { %v705_v59 = vrot.slane %v704_v49, 2  ;;  %v727_v60 = vrot.slane %v726_v50, 4  ;;  %v663_v61 = vadd.f32 %v630_v52, %v590_v51  ;;  %v717_v1 = vsel %vm612_vm2, %v666_v56, -inf }
 0x116   : > { %v709_v63 = vsel %vm612_vm2, %v664_v53, -inf  ;;  %v718_v5 = vmax.f32 %v665_v0, %v717_v1  ;;  %v742_v19 = vadd.f32 %v900_v57, %v692_v62  ;;  %v740_v13 = vadd.f32 %v900_v57, %v676_v54 }
 0x117   : > { %v706_v2 = vmax.f32 %v704_v49, %v705_v59  ;;  %v728_v3 = vmax.f32 %v726_v50, %v727_v60  ;;  %v710_v23 = vmax.f32 %v663_v61, %v709_v63  ;;  %v743_v33 = vadd.f32 %v900_v57, %v700_v29 }
 0x118   : > { %v719_v9 = vrot.slane %v718_v5, 4  ;;  %1006 = vtanh.f32 %v742_v19 }
 0x119   : > { %v707_v6 = vrot.slane %v706_v2, 1  ;;  %v729_v7 = vrot.slane %v728_v3, 2  ;;  %v711_v8 = vrot.slane %v710_v23, 4  ;;  %1008 = vtanh.f32 %v740_v13 }
 0x11a   : > { %v720_v14 = vmax.f32 %v718_v5, %v719_v9  ;;  %1010 = vtanh.f32 %v743_v33 }
 0x11b   : > { %v708_v10 = vmax.f32 %v706_v2, %v707_v6  ;;  %v730_v11 = vmax.f32 %v728_v3, %v729_v7  ;;  %v712_v12 = vmax.f32 %v710_v23, %v711_v8 }
 0x11c   : > { %v721_v18 = vrot.slane %v720_v14, 2  ;;  %v1005_v25 = vpop.eup %1004 }
 0x11d   : > { %v731_v15 = vrot.slane %v730_v11, 1  ;;  %v713_v16 = vrot.slane %v712_v12, 2  ;;  %v744_v17 = vadd.f32 %v900_v57, %v708_v10  ;;  %v764_v40 = vrot.slane %v1005_v25, 7 }
 0x11e   : > { %v722_v24 = vmax.f32 %v720_v14, %v721_v18 }
 0x11f   : > { %v732_v20 = vmax.f32 %v730_v11, %v731_v15  ;;  %v714_v22 = vmax.f32 %v712_v12, %v713_v16  ;;  %1012 = vtanh.f32 %v744_v17 }
 0x120   : > { %v723_v31 = vrot.slane %v722_v24, 1 }
 0x121   : > { %v715_v26 = vrot.slane %v714_v22, 1  ;;  %v747_v28 = vadd.f32 %v900_v57, %v732_v20 }
 0x122   : > { %v724_v32 = vmax.f32 %v722_v24, %v723_v31 }
 0x123   : > { %v716_v30 = vmax.f32 %v714_v22, %v715_v26  ;;  %1014 = vtanh.f32 %v747_v28 }
 0x124   : > { %v746_v37 = vadd.f32 %v900_v57, %v724_v32 }
 0x125   : > { %v745_v36 = vadd.f32 %v900_v57, %v716_v30  ;;  %v1007_v38 = vpop.eup %1006 }
 0x126   : > { %v1009_v39 = vpop.eup %1008  ;;  %v767_v41 = vrot.slane %v1007_v38, 6 }
 0x127   : > { %1016 = vtanh.f32 %v745_v36  ;;  %v1011_v27 = vpop.eup %1010  ;;  %v766_v42 = vsel %vm765_vm3, %v764_v40, %v1009_v39 }
 0x128   : > { %1018 = vtanh.f32 %v746_v37  ;;  %v770_v43 = vrot.slane %v1011_v27, 5  ;;  %v769_v45 = vsel %vm768_vm4, %v767_v41, %v766_v42 }
 0x12a   : > { %v772_v48 = vsel %vm771_vm5, %v770_v43, %v769_v45 }
 0x12c   : > { %v1013_v34 = vpop.eup %1012 }
 0x12d   : > { %v773_v35 = vrot.slane %v1013_v34, 4 }
 0x12f   : > { %v775_v49 = vsel %vm774_vm6, %v773_v35, %v772_v48 }
 0x130   : > { %v1015_v44 = vpop.eup %1014 }
 0x131   : > { %v782_v52 = vrot.slane %v1015_v44, 1 }
 0x134   : > { %v1017_v46 = vpop.eup %1016 }
 0x135   : > { %v1019_v47 = vpop.eup %1018  ;;  %v776_v21 = vrot.slane %v1017_v46, 3 }
 0x136   : > { %v779_v50 = vrot.slane %v1019_v47, 2 }
 0x137   : > { %v778_v51 = vsel %vm777_vm7, %v776_v21, %v775_v49 }
 0x138   : > { %v781_v53 = vsel %vm780_vm8, %v779_v50, %v778_v51 }
 0x139   : > { %v784_v55 = vsel %vm783_vm9, %v782_v52, %v781_v53 }
 0x13a   : > { %786 = vst [vmem:[%s164_s7] sm:$0xff] %v784_v55 }
 0x13b   : > { %1033 = shalt.err (!%p1030_p3)
}
 0x13c   : > { %s1034_s25 = scalar_lea.hbm %s1279_s11, 128  ;;  %s1038_s28 = scalar_lea.hbm %s1319_s3, 256 }
 0x13d   : > { %p1035_p4 = scmp.ne.s32.totalorder %s1279_s11, %s1034_s25  ;;  %p1039_p9 = scmp.lt.s32.totalorder %s1279_s11, %s1319_s3 }
 0x13e   : > { %p1040_p10 = scmp.lt.s32.totalorder %s1038_s28, %s1034_s25 }
 0x13f   : > { %p1036_p7 = pnand %p1035_p4, %p1142_p5 }
 0x140   : > { %p1041_p11 = por %p1040_p10, %p1039_p9 }
 0x141   : > { %p1037_p8 = pneg %p1036_p7 }
 0x143   : > { %p1042_p12 = pnand %p1041_p11, %p1037_p8 }
 0x145   : > { %1045 = shalt.err (!%p1042_p12)
}
 0x146   : > { %944 = dma.vmem_to_hbm [thread:$0]  (%p1142_p5), %s802_s8, 128, %s1279_s11, %s788_s17  }
 0x147 PF: > { %p950_p13 = scmp.ge.s32.totalorder %s1080_s15, 2  ;;  %s813_s4 = sand.u32 1, %s1068_s12  }
 0x148   : > { %s814_s5 = scalar_lea.sflag [#allocation3], %s813_s4 }
 0x149   : > { %p947_p0 = pnand %p950_p13, %p1146_p6 }
 0x14b   : > { %p948_p1 = pneg %p947_p0 }
 0x14d   : > { %1063 = dma.done.wait (%p948_p1), %s814_s5, 128  }
 0x14e   : > { %1065 = vsyncadd (%p948_p1), %s814_s5, 4294967168  ;;  %p13_p2 = scmp.ge.s32.totalorder %s1129_s18, 4   ;;  %s1322_s12 = smov %s1072_s13 }
 0x14f   : > { %s1323_s13 = smov %s1076_s14  ;;  %s1324_s14 = smov %s1140_s21 }
 0x150   : > { %s1325_s15 = smov %s1129_s18  ;;  %15 = sbr.rel (!%p13_p2) target bundleno = 3 (0x3), region = 67 }
 0x155   :  { %819 = vsyncpa [#allocation3], 1 }
 0x156   :  { %821 = vsyncpa [#allocation3 + $0x1], 1 }

</bundles_post_ra>
